<compile_context>
chip_gen: v6e
topology: v6e:2x2x1
jax: 0.10.0
libtpu: 0.0.40
codegen_flags: <defaults>
</compile_context>

<pallas_src>
import functools
import math

import jax
import jax.numpy as jnp
import numpy as np
from jax.experimental import pallas as pl
from jax.experimental.pallas import tpu as pltpu


def _round_up(x, m):
    return ((x + m - 1) // m) * m


# --------------------------------------------------------------------------- #
# Kernel
# --------------------------------------------------------------------------- #
def _posemb_kernel(pk_ref, ids_ref, freqs_ref, tri_ref, out_ref, carry_ref, *,
                   padding_idx):
    """One (batch row, sequence tile) step.

    pk_ref    : SMEM (1,)        int32  -- past_key_values_length (scalar prefetch)
    ids_ref   : VMEM (TS, 1)     int32  -- ids tile, sequence on the sublane axis
    freqs_ref : VMEM (1, half)   f32    -- inverse frequencies (resident)
    tri_ref   : VMEM (TS, TS)    bf16   -- lower-triangular 0/1 matrix (resident)
    out_ref   : VMEM (TS, 2*half) f32
    carry_ref : VMEM (1, 1)      f32    -- running non-pad count across seq tiles
    """
    s = pl.program_id(1)

    @pl.when(s == 0)
    def _():
        carry_ref[...] = jnp.zeros_like(carry_ref)

    ids = ids_ref[...]                                        # (TS, 1) int32
    ts = ids.shape[0]
    not_pad = ids != padding_idx                              # (TS, 1) bool
    mask_f = not_pad.astype(jnp.float32)

    # Inclusive cumsum along the tile: lower-triangular matmul on the MXU.
    # Operands are exact 0/1 values in bf16; accumulation is f32 -> exact.
    cums = jnp.dot(tri_ref[...], not_pad.astype(jnp.bfloat16),
                   preferred_element_type=jnp.float32)        # (TS, 1)
    cums = cums + carry_ref[...]                              # carry from earlier tiles
    carry_ref[...] = cums[ts - 1:ts, :]                       # update running count

    past_kv = pk_ref[0].astype(jnp.float32)                   # runtime scalar
    pos = (cums + past_kv) * mask_f + float(padding_idx)      # exact small ints in f32

    ang = pos * freqs_ref[...]                                # (TS, half) broadcast
    emb = jnp.concatenate([jnp.sin(ang), jnp.cos(ang)], axis=-1)   # (TS, 2*half)
    # Padding tokens map to the zeroed padding_idx row of the reference table.
    out_ref[...] = (emb * mask_f).astype(out_ref.dtype)


# --------------------------------------------------------------------------- #
# pallas_call wrapper
# --------------------------------------------------------------------------- #
@functools.partial(jax.jit, static_argnames=("padding_idx", "embedding_dim", "ts"))
def _posemb_call(ids_padded, past_kv, *, padding_idx, embedding_dim, ts):
    """ids_padded: (B, S_pad) int32, past_kv: (1,) int32 -> (B, S_pad, 2*half) f32."""
    bsz, s_pad = ids_padded.shape
    half = embedding_dim // 2
    scale = math.log(10000) / (half - 1)
    freqs = jnp.exp(jnp.arange(half, dtype=jnp.float32) * -scale).reshape(1, half)

    row = jax.lax.broadcasted_iota(jnp.int32, (ts, ts), 0)
    col = jax.lax.broadcasted_iota(jnp.int32, (ts, ts), 1)
    tri = (col <= row).astype(jnp.bfloat16)                   # (TS, TS) lower-tri

    ids3 = ids_padded.astype(jnp.int32)[..., None]            # (B, S_pad, 1)
    kernel = functools.partial(_posemb_kernel, padding_idx=padding_idx)

    grid_spec = pltpu.PrefetchScalarGridSpec(
        num_scalar_prefetch=1,                                # past_key_values_length
        grid=(bsz, s_pad // ts),
        in_specs=[
            pl.BlockSpec((None, ts, 1), lambda b, s, pk: (b, s, 0)),   # ids tile
            pl.BlockSpec((1, half), lambda b, s, pk: (0, 0)),          # freqs (resident)
            pl.BlockSpec((ts, ts), lambda b, s, pk: (0, 0)),           # tri (resident)
        ],
        out_specs=pl.BlockSpec((None, ts, 2 * half), lambda b, s, pk: (b, s, 0)),
        scratch_shapes=[pltpu.VMEM((1, 1), jnp.float32)],     # running non-pad count
    )
    return pl.pallas_call(
        kernel,
        out_shape=jax.ShapeDtypeStruct((bsz, s_pad, 2 * half), jnp.float32),
        grid_spec=grid_spec,
        compiler_params=pltpu.CompilerParams(
            dimension_semantics=("parallel", "arbitrary")),
    )(past_kv, ids3, freqs, tri)


# --------------------------------------------------------------------------- #
# Module
# --------------------------------------------------------------------------- #
def make_sinusoidal_weights(num_embeddings, embedding_dim, padding_idx=None):
    """Deterministic init, identical math to the PyTorch get_embedding."""
    half_dim = embedding_dim // 2
    scale = math.log(10000) / (half_dim - 1)
    freqs = jnp.exp(jnp.arange(half_dim, dtype=jnp.float32) * -scale)
    ang = jnp.arange(num_embeddings, dtype=jnp.float32)[:, None] * freqs[None, :]
    emb = jnp.concatenate([jnp.sin(ang), jnp.cos(ang)], axis=1).reshape(num_embeddings, -1)
    if embedding_dim % 2 == 1:
        emb = jnp.concatenate([emb, jnp.zeros((num_embeddings, 1), jnp.float32)], axis=1)
    if padding_idx is not None:
        emb = emb.at[padding_idx, :].set(0.0)
    return emb


class SinusoidalPositionalEmbeddingPallas:
    """JAX/Pallas port of the PyTorch module (forward pass only)."""

    OFFSET = 2

    def __init__(self, num_positions, embedding_dim, padding_idx=None):
        self.embedding_dim = embedding_dim
        self.padding_idx = padding_idx if padding_idx is not None else 0
        # Table kept only for parity with the PyTorch parameter / reference;
        # the kernel computes sin/cos directly so it never needs regrowth.
        self.weights = make_sinusoidal_weights(
            num_positions + self.OFFSET, embedding_dim, self.padding_idx)

    def __call__(self, input_ids, past_key_values_length=0):
        bsz, seq_len = input_ids.shape
        max_pos = self.padding_idx + 1 + seq_len
        if max_pos > self.weights.shape[0]:   # mirror the PyTorch forward's regrow
            self.weights = make_sinusoidal_weights(
                max_pos + self.OFFSET, self.embedding_dim, self.padding_idx)

        # Tile the sequence axis; the padded tail (id == padding_idx) is masked
        # in-kernel, does not disturb the running count, and is sliced off below.
        ts = min(256, _round_up(seq_len, 8))
        s_pad = _round_up(seq_len, ts)
        ids = input_ids.astype(jnp.int32)
        if s_pad != seq_len:
            ids = jnp.pad(ids, ((0, 0), (0, s_pad - seq_len)),
                          constant_values=self.padding_idx)
        past_kv = jnp.asarray([past_key_values_length], dtype=jnp.int32)

        out = _posemb_call(ids, past_kv, padding_idx=self.padding_idx,
                           embedding_dim=self.embedding_dim, ts=ts)

        if out.shape[-1] != self.embedding_dim:   # odd embedding_dim: zero last col
            out = jnp.pad(out, ((0, 0), (0, 0),
                                (0, self.embedding_dim - out.shape[-1])))
        return out[:, :seq_len, :]


# --------------------------------------------------------------------------- #
# Reference + test
# --------------------------------------------------------------------------- #
def _reference(input_ids, weights, padding_idx, past_kv_len=0):
    """Pure-JAX reference of the PyTorch forward (table gather)."""
    mask = (input_ids != padding_idx).astype(jnp.int32)
    pos = (jnp.cumsum(mask, axis=1) + past_kv_len) * mask + padding_idx
    flat = jnp.take(weights, pos.reshape(-1), axis=0)
    return flat.reshape(input_ids.shape[0], input_ids.shape[1], -1)


if __name__ == "__main__":
    num_positions = 16
    embedding_dim = 32
    padding_idx = 1
    B, S = 2, 8

    key = jax.random.PRNGKey(0)
    input_ids = jax.random.randint(key, (B, S), minval=0, maxval=num_positions,
                                   dtype=jnp.int32)
    # Force some padding tokens so the padding path is exercised.
    input_ids = input_ids.at[0, -2:].set(padding_idx)
    input_ids = input_ids.at[1, -1:].set(padding_idx)

    module = SinusoidalPositionalEmbeddingPallas(num_positions, embedding_dim,
                                                 padding_idx)

    out0 = jax.block_until_ready(module(input_ids, past_key_values_length=0))
    ref0 = _reference(input_ids, module.weights, padding_idx, 0)
    assert out0.shape == (B, S, embedding_dim), out0.shape
    assert np.allclose(np.asarray(out0), np.asarray(ref0), atol=1e-4), \
        "mismatch vs reference (past_kv=0)"

    # past_key_values_length is a runtime SMEM scalar -> same compiled kernel.
    out3 = jax.block_until_ready(module(input_ids, past_key_values_length=3))
    ref3 = _reference(input_ids, module.weights, padding_idx, 3)
    assert np.allclose(np.asarray(out3), np.asarray(ref3), atol=1e-4), \
        "mismatch vs reference (past_kv=3)"

    print("KERNEL_OK")
</pallas_src>

<mosaic_0001>
module attributes {stable_mosaic.version = 11 : i64} {
  func.func @_posemb_kernel(%arg0: i32, %arg1: i32, %arg2: memref<1xi32, #tpu.memory_space<smem>>, %arg3: memref<1x8x1xi32, #tpu.memory_space<vmem>>, %arg4: memref<1x16xf32, #tpu.memory_space<vmem>>, %arg5: memref<8x8xbf16, #tpu.memory_space<vmem>>, %arg6: memref<1x8x32xf32, #tpu.memory_space<vmem>>, %arg7: memref<1x1xf32, #tpu.memory_space<vmem>>) attributes {dimension_semantics = [#tpu.dimension_semantics<parallel>, #tpu.dimension_semantics<arbitrary>], iteration_bounds = array<i64: 2, 1>, scalar_prefetch = 1 : i64, scratch_operands = 1 : i64, tpu.core_type = #tpu.core_type<tc>, window_params = [{transform_indices = @transform_0, window_bounds = array<i64: 1, 8, 1>}, {pipeline_mode = #tpu.pipeline_mode<synchronous>, transform_indices = @transform_1, window_bounds = array<i64: 1, 16>}, {pipeline_mode = #tpu.pipeline_mode<synchronous>, transform_indices = @transform_2, window_bounds = array<i64: 8, 8>}, {transform_indices = @transform_3, window_bounds = array<i64: 1, 8, 32>}]} {
    %c0_i32 = arith.constant 0 : i32
    %0 = arith.cmpi eq, %arg1, %c0_i32 : i32
    %1 = arith.extui %0 : i1 to i32
    %c0_i32_0 = arith.constant 0 : i32
    %2 = arith.cmpi ne, %1, %c0_i32_0 : i32
    scf.if %2 {
      %cst_16 = arith.constant 0.000000e+00 : f32
      %38 = vector.broadcast %cst_16 : f32 to vector<1x1xf32>
      %c0_17 = arith.constant 0 : index
      %c0_18 = arith.constant 0 : index
      %39 = vector.load %arg7[%c0_17, %c0_18] : memref<1x1xf32, #tpu.memory_space<vmem>>, vector<1x1xf32>
      tpu.vector_store %arg7[%c0_17, %c0_18], %38 {strides = array<i32>} : memref<1x1xf32, #tpu.memory_space<vmem>>, vector<1x1xf32>,
    } else {
    }
    %c0 = arith.constant 0 : index
    %c0_1 = arith.constant 0 : index
    %c0_2 = arith.constant 0 : index
    %3 = vector.load %arg3[%c0, %c0_1, %c0_2] : memref<1x8x1xi32, #tpu.memory_space<vmem>>, vector<1x8x1xi32>
    %4 = vector.shape_cast %3 : vector<1x8x1xi32> to vector<8x1xi32>
    %c1_i32 = arith.constant 1 : i32
    %5 = vector.broadcast %c1_i32 : i32 to vector<8x1xi32>
    %6 = arith.cmpi ne, %4, %5 : vector<8x1xi32>
    %7 = arith.extui %6 : vector<8x1xi1> to vector<8x1xi32>
    %8 = arith.sitofp %7 : vector<8x1xi32> to vector<8x1xf32>
    %c0_3 = arith.constant 0 : index
    %c0_4 = arith.constant 0 : index
    %9 = vector.load %arg5[%c0_3, %c0_4] : memref<8x8xbf16, #tpu.memory_space<vmem>>, vector<8x8xbf16>
    %10 = arith.extui %6 : vector<8x1xi1> to vector<8x1xi32>
    %11 = arith.sitofp %10 : vector<8x1xi32> to vector<8x1xf32>
    %12 = arith.truncf %11 : vector<8x1xf32> to vector<8x1xbf16>
    %cst = arith.constant dense<0.000000e+00> : vector<8x1xf32>
    %13 = tpu.matmul %9, %12, %cst {dimension_numbers = #tpu.dot_dimension_numbers<[1], [0], [0], [1], [0, 0, 1, 1], [], []>} : vector<8x8xbf16>, vector<8x1xbf16>, vector<8x1xf32> -> vector<8x1xf32>
    %c0_5 = arith.constant 0 : index
    %c0_6 = arith.constant 0 : index
    %14 = vector.load %arg7[%c0_5, %c0_6] : memref<1x1xf32, #tpu.memory_space<vmem>>, vector<1x1xf32>
    %15 = vector.broadcast %14 : vector<1x1xf32> to vector<8x1xf32>
    %16 = arith.addf %13, %15 : vector<8x1xf32>
    %17 = vector.extract_strided_slice %16 {offsets = [7, 0], sizes = [1, 1], strides = [1, 1]} : vector<8x1xf32> to vector<1x1xf32>
    %c0_7 = arith.constant 0 : index
    %c0_8 = arith.constant 0 : index
    %18 = vector.load %arg7[%c0_7, %c0_8] : memref<1x1xf32, #tpu.memory_space<vmem>>, vector<1x1xf32>
    tpu.vector_store %arg7[%c0_7, %c0_8], %17 {strides = array<i32>} : memref<1x1xf32, #tpu.memory_space<vmem>>, vector<1x1xf32>,
    %c0_9 = arith.constant 0 : index
    %19 = memref.load %arg2[%c0_9] : memref<1xi32, #tpu.memory_space<smem>>
    %20 = arith.sitofp %19 : i32 to f32
    %21 = vector.broadcast %20 : f32 to vector<8x1xf32>
    %22 = arith.addf %16, %21 : vector<8x1xf32>
    %23 = arith.mulf %22, %8 : vector<8x1xf32>
    %cst_10 = arith.constant 1.000000e+00 : f32
    %24 = vector.broadcast %cst_10 : f32 to vector<8x1xf32>
    %25 = arith.addf %23, %24 : vector<8x1xf32>
    %c0_11 = arith.constant 0 : index
    %c0_12 = arith.constant 0 : index
    %26 = vector.load %arg4[%c0_11, %c0_12] : memref<1x16xf32, #tpu.memory_space<vmem>>, vector<1x16xf32>
    %27 = vector.broadcast %25 : vector<8x1xf32> to vector<8x16xf32>
    %28 = vector.broadcast %26 : vector<1x16xf32> to vector<8x16xf32>
    %29 = arith.mulf %27, %28 : vector<8x16xf32>
    %30 = math.sin %29 : vector<8x16xf32>
    %31 = math.cos %29 : vector<8x16xf32>
    %32 = tpu.concatenate %30, %31 in 1 : vector<8x16xf32>, vector<8x16xf32> -> vector<8x32xf32>
    %33 = vector.broadcast %8 : vector<8x1xf32> to vector<8x32xf32>
    %34 = arith.mulf %32, %33 : vector<8x32xf32>
    %c0_13 = arith.constant 0 : index
    %c0_14 = arith.constant 0 : index
    %c0_15 = arith.constant 0 : index
    %35 = vector.load %arg6[%c0_13, %c0_14, %c0_15] : memref<1x8x32xf32, #tpu.memory_space<vmem>>, vector<1x8x32xf32>
    %36 = vector.shape_cast %35 : vector<1x8x32xf32> to vector<8x32xf32>
    %37 = vector.shape_cast %34 : vector<8x32xf32> to vector<1x8x32xf32>
    tpu.vector_store %arg6[%c0_13, %c0_14, %c0_15], %37 {strides = array<i32>} : memref<1x8x32xf32, #tpu.memory_space<vmem>>, vector<1x8x32xf32>,
    return
  }
  func.func @transform_0(%arg0: i32, %arg1: i32, %arg2: memref<1xi32, #tpu.memory_space<smem>>) -> (i32, i32, i32) {
    %c0_i32 = arith.constant 0 : i32
    %c0_i32_0 = arith.constant 0 : i32
    return %arg0, %arg1, %c0_i32 : i32, i32, i32
  }
  func.func @transform_1(%arg0: i32, %arg1: i32, %arg2: memref<1xi32, #tpu.memory_space<smem>>) -> (i32, i32) {
    %c0_i32 = arith.constant 0 : i32
    %c0_i32_0 = arith.constant 0 : i32
    %c0_i32_1 = arith.constant 0 : i32
    return %c0_i32, %c0_i32_0 : i32, i32
  }
  func.func @transform_2(%arg0: i32, %arg1: i32, %arg2: memref<1xi32, #tpu.memory_space<smem>>) -> (i32, i32) {
    %c0_i32 = arith.constant 0 : i32
    %c0_i32_0 = arith.constant 0 : i32
    %c0_i32_1 = arith.constant 0 : i32
    return %c0_i32, %c0_i32_0 : i32, i32
  }
  func.func @transform_3(%arg0: i32, %arg1: i32, %arg2: memref<1xi32, #tpu.memory_space<smem>>) -> (i32, i32, i32) {
    %c0_i32 = arith.constant 0 : i32
    %c0_i32_0 = arith.constant 0 : i32
    return %arg0, %arg1, %c0_i32 : i32, i32, i32
  }
}

</mosaic_0001>

<bundles_post_ra>
// kernel: _posemb_call.1
= control target key start
LH: loop header
LB: loop body
LE: loop exit
PB: predicated region body
PF: predicated region fallthrough
CT: control target
= control target key end

     0   :  { %s937_s0 = inlined_call_operand.<no memory space> [shape: s32[1], index: 0, kind: input, shape index: {}]   ;;  %s938_s1 = inlined_call_operand.vmem [shape: s32[2,8,1], index: 1, kind: input, shape index: {}]   ;;  %s939_s2 = inlined_call_operand.vmem [shape: f32[1,16], index: 2, kind: input, shape index: {}]   ;;  %s940_s3 = inlined_call_operand.vmem [shape: bf16[8,8], index: 3, kind: input, shape index: {}]   ;;  %s941_s4 = inlined_call_operand.hbm [shape: f32[2,8,32], index: 4, kind: output, shape index: {}]  }
   0x1   :  { %9 = sst [smem:[#allocation4]] %s937_s0 }
   0x2   :  { %10 = vsyncpa [#allocation6], 0 }
   0x3   :  { %12 = vsyncpa [#allocation6 + $0x1], 0  ;;  %s811_s17 = smov 0   ;;  %s813_s18 = smov 0  }
   0x4   :  { %s815_s19 = smov 0   ;;  %s817_s20 = smov 0  }
   0x5   :  { %s819_s21 = smov 0   ;;  %s821_s22 = smov 0  }
   0x6 LB: > { %s589_s0 = sadd.s32 4294967295, %s770_s22   ;;  %s590_s23 = sadd.s32 4294967294, %s770_s22   ;;  %s770_s22 = sphi %s821_s22, %s18_s22   ;;  %s766_s21 = sphi %s819_s21, %s948_s21   ;;  %s762_s20 = sphi %s817_s20, %s947_s20   ;;  %s758_s19 = sphi %s815_s19, %s946_s19   ;;  %s754_s18 = sphi %s813_s18, %s945_s18   ;;  %s750_s17 = sphi %s811_s17, %s944_s17  }
   0x7   : > { %s30_s24 = sadd.s32 1, %s766_s21  ;;  %s109_s25 = sadd.s32 1, %s758_s19 }
   0x8   : > { %p32_p0 = scmp.ge.s32.totalorder %s30_s24, 2  ;;  %p119_p1 = scmp.ne.s32.totalorder %s758_s19, %s754_s18 }
   0x9   : > { %p120_p2 = scmp.eq.s32.totalorder %s589_s0, 1  ;;  %p125_p3 = scmp.ne.s32.totalorder %s754_s18, %s750_s17 }
   0xa   : > { %s950_s24 = smov (%p32_p0, %s30_s24), 0  ;;  %p126_p5 = scmp.eq.s32.totalorder %s590_s23, 1 }
   0xb   : > { %p851_p4 = por %p120_p2, %p119_p1  ;;  %s104_s27 = ssub.s32 %s766_s21, %s950_s24 }
   0xc   : > { %p593_p6 = scmp.ge.s32.totalorder %s770_s22, 1  ;;  %p107_p7 = scmp.eq.s32.totalorder %s104_s27, 0 }
   0xd   : > { %p858_p8 = por %p126_p5, %p125_p3  ;;  %p160_p9 = scmp.lt.s32.totalorder %s770_s22, 3 }
   0xe   : > { %s864_s29 = scalar_select %p107_p7, %s758_s19, %s109_s25  }
   0xf   : > { %p161_p10 = pnand %p593_p6, %p160_p9 }
  0x10   : > { %p186_p11 = scmp.lt.s32.totalorder (!%p161_p10), %s762_s20, 1  ;;  %s263_s11 = sld [smem:[#allocation4]] (!%p161_p10) }
  0x11   : > { %164 = sbr.rel (%p161_p10) target bundleno = 575 (0x23f), region = 32  ;;  %s781_s15 = smov (!%p161_p10), 16  }
  0x12   : > { %s183_s16 = sand.u32 (!%p161_p10), 1, %s754_s18   ;;  %s609_s23 = sshll.u32 (!%p161_p10), %s762_s20, 7 }
  0x13   : > { %s594_s0 = sshll.u32 (!%p161_p10), %s183_s16, 3  ;;  %s516_s6 = scalar_lea.hbm (!%p161_p10), %s941_s4, %s609_s23 }
  0x14   : > { %s185_s25 = scalar_lea.vmem (!%p161_p10), [#allocation5], %s594_s0  ;;  %s504_s7 = scalar_lea.sflag (!%p161_p10), [#allocation6], %s183_s16 }
  0x15   : > { %s518_s27 = sshll.u32 (!%p161_p10), %s185_s25, 4  ;;  %s519_s27 = int_to_ptr.vmem [resolvable:$true] %s518_s27 }
  0x16   : > { %vm198_vm0 = vcmask 0   ;;  %v772_v0 = vmov 0.0   ;;  %vm773_vm1 = vmmov 0   ;;  %s187_s30 = scalar_select %p186_p11, %s762_s20, 1  ;;  %vm217_vm3 = vcmask 1043456  }
  0x17   : > { %199 = vst.msk [vmem:[#allocation2] sm:$0x1] %vm198_vm0, %v772_v0  ;;  %614 = vmatprep.subr.bf16.mxu0 %v772_v0  ;;  %616 = vmatprep.mubr.msk.bf16.mxu0 %vm773_vm1, %v772_v0  ;;  %v204_v5 = vld [vmem:[%s940_s3] sm:$0xf]  ;;  %vm213_vm4 = vcmask 64512   ;;  %v774_v6 = vmov 0   ;;  %s264_s12 = scvt.s32.f32 %s263_s11 }
  0x18   : > { %s595_s5 = sshll.u32 %s187_s30, 3  ;;  %689 = vset.pattern.permute.xlu0 %v774_v6  ;;  %vm261_vm5 = vcmask 7175   ;;  %v599_v17 = vld [vmem:[%s939_s2] ss:$0 sm:$0xff]  ;;  %v775_v31 = vmov 2102212464  }
  0x19   : > { %s192_s8 = scalar_lea.vmem %s938_s1, %s595_s5  ;;  %v265_v9 = vstv %s264_s12  ;;  %v776_v33 = vmov 920167782   ;;  %v777_v37 = vmov 1326507024   ;;  %v778_v39 = vmov 683565275  }
  0x1a   : > { %v200_v1 = vld [vmem:[%s192_s8] sm:$0xff]  ;;  %v779_v41 = vmov 2475754826   ;;  %v780_v44 = vmov 2131351028   ;;  %s694_s8 = scalar_lea.vmem %s519_s27, 128 }
  0x1b   : > { %vm201_vm2 = vcmp.ne.s32.totalorder %v200_v1, 1  ;;  %p695_p12 = scmp.ne.s32.totalorder %s519_s27, %s694_s8  ;;  %s782_s20 = smov [#allocation5]  }
  0x1c   : > { %v596_v2 = vsel %vm201_vm2, 1.0, %v772_v0  ;;  %s698_s9 = sshll.u32 %s782_s20, 4  ;;  %s699_s9 = int_to_ptr.vmem [resolvable:$false] %s698_s9 }
  0x1d   : > { %v205_v3 = vpack.c.bf16 %v596_v2, %v596_v2  ;;  %p696_p13 = pnand %p695_p12, %p851_p4  ;;  %s700_s10 = scalar_lea.vmem %s699_s9, 256 }
  0x1e   : > { %v597_v7 = vld [vmem:[#allocation2] ss:$0 sm:$0xff]  ;;  %p701_p1 = scmp.lt.s32.totalorder %s519_s27, %s699_s9  ;;  %p702_p2 = scmp.lt.s32.totalorder %s700_s10, %s694_s8 }
  0x1f   : > { %v219_v4 = vsel %vm217_vm3, %v205_v3, 0  ;;  %p697_p0 = pneg %p696_p13 }
  0x20   : > { %615 = vmatpush3.bf16.msra.mxu0 %v219_v4  ;;  %p703_p3 = por %p702_p2, %p701_p1 }
  0x22   : > { %p704_p5 = pnand %p703_p3, %p697_p0 }
  0x23   : > { %617 = vmatmul.mubr.msk.bf16.vlgmr.msra.gmra.mxu0 %vm213_vm4, %v204_v5 }
  0xe3   : > { %v255_v8 = vpop.f32.mrf.mxu0 }
  0xe4   : > { %v256_v10 = vadd.f32 %v597_v7, %v255_v8 }
  0xe5   : > { %v618_v11 = vpop.f32.mrf.mxu0 }
  0xe6   : > { %262 = vst.msk [vmem:[#allocation2 - $0x7] sm:$0x80] %vm261_vm5, %v256_v10  ;;  %v266_v12 = vadd.f32 %v265_v9, %v256_v10 }
  0xe7   : > { %v258_v13 = vpop.f32.mrf.mxu0 }
  0xe8   : > { %v267_v14 = vmul.f32 %v596_v2, %v266_v12 }
  0xe9   : > { %v619_v15 = vpop.f32.mrf.mxu0 }
  0xea   : > { %v268_v16 = vadd.f32 1.0, %v267_v14 }
  0xec   : > { %272 = vperm.xlu0 %689, %v268_v16  }
  0xf0   : > { %497 = vperm.xlu0 %689, %v596_v2  }
 0x167   : > { %v273_v18 = vpop.permute.xlu0 %272 }
 0x168   : > { %v877_v19 = vmul.f32 %v599_v17, %v273_v18 }
 0x16a   : > { %v285_v20 = vand.u32 2139095040, %v877_v19  ;;  %v282_v21 = vand.u32 2147483647, %v877_v19  ;;  %vm284_vm13 = vcmp.lt.s32.totalorder %v877_v19, 0  ;;  %vm374_vm5 = vweird.f32 %v877_v19 }
 0x16c   : > { %v286_v22 = vshrl.u32 %v285_v20, 23  ;;  %v289_v24 = vand.u32 8388607, %v282_v21  ;;  %vm283_vm14 = vcmp.le.f32.partialorder %v282_v21, 0.7853982 }
 0x16e   : > { %v600_v23 = vadd.s32 4294967169, %v286_v22  ;;  %v290_v27 = vor.u32 8388608, %v289_v24 }
 0x170   : > { %v292_v25 = vadd.s32 1, %v600_v23  ;;  %v330_v35 = vshll.u32 %v290_v27, 8 }
 0x172   : > { %vm293_vm6 = vcmp.gt.s32.totalorder %v292_v25, 0 }
 0x173   : > { %v294_v26 = vsel %vm293_vm6, %v292_v25, 0  ;;  %vm493_vm6 = vcmask 130048  }
 0x174   : > { %v296_v28 = vand.u32 31, %v294_v26  ;;  %v295_v29 = vshrl.u32 %v294_v26, 5 }
 0x176   : > { %v297_v30 = vsub.s32 32, %v296_v28  ;;  %v308_v32 = vshll.u32 %v775_v31, %v296_v28  ;;  %v311_v34 = vshll.u32 %v776_v33, %v296_v28  ;;  %v299_v40 = vshll.u32 %v778_v39, %v296_v28 }
 0x177   : > { %v302_v43 = vshll.u32 %v779_v41, %v296_v28  ;;  %v305_v46 = vshll.u32 %v780_v44, %v296_v28  ;;  %vm317_vm7 = vcmp.lt.s32.totalorder %v295_v29, 4  ;;  %vm314_vm8 = vcmp.lt.s32.totalorder %v295_v29, 1 }
 0x178   : > { %v309_v36 = vshrl.u32 %v776_v33, %v297_v30  ;;  %v312_v38 = vshrl.u32 %v777_v37, %v297_v30  ;;  %v300_v42 = vshrl.u32 %v779_v41, %v297_v30  ;;  %v303_v45 = vshrl.u32 %v780_v44, %v297_v30 }
 0x179   : > { %v306_v47 = vshrl.u32 %v775_v31, %v297_v30  ;;  %v298_v51 = vshrl.u32 %v778_v39, %v297_v30  ;;  %vm315_vm9 = vcmp.lt.s32.totalorder %v295_v29, 2  ;;  %vm316_vm10 = vcmp.lt.s32.totalorder %v295_v29, 3 }
 0x17a   : > { %v310_v48 = vor.u32 %v309_v36, %v308_v32  ;;  %v313_v49 = vor.u32 %v312_v38, %v311_v34  ;;  %v301_v50 = vor.u32 %v300_v42, %v299_v40  ;;  %v304_v52 = vor.u32 %v303_v45, %v302_v43 }
 0x17b   : > { %v307_v53 = vor.u32 %v306_v47, %v305_v46 }
 0x17c   : > { %v323_v54 = vsel %vm317_vm7, %v310_v48, 920167782  ;;  %v327_v55 = vsel %vm317_vm7, %v313_v49, 1326507024  ;;  %v322_v57 = vsel %vm314_vm8, %v301_v50, %v304_v52  ;;  %v318_v60 = vsel %vm314_vm8, %v298_v51, %v301_v50 }
 0x17d   : > { %v319_v56 = vsel %vm317_vm7, %v307_v53, 2102212464  ;;  %v324_v58 = vsel %vm316_vm10, %v307_v53, %v323_v54  ;;  %v326_v59 = vsel %vm314_vm8, %v304_v52, %v307_v53  ;;  %v328_v63 = vsel %vm316_vm10, %v310_v48, %v327_v55  ;;  %v498_v54 = vpop.permute.xlu0 %497 }
 0x17e   : > { %v320_v61 = vsel %vm316_vm10, %v304_v52, %v319_v56  ;;  %v325_v62 = vsel %vm315_vm9, %v322_v57, %v324_v58  ;;  %v329_v0 = vsel %vm315_vm9, %v326_v59, %v328_v63  ;;  %vm501_vm7 = vcmask 261120  }
 0x17f   : > { %v883_v1 = vmul.u32.u64.low %v330_v35, %v325_v62  ;;  %v884_v2 = vmul.u32.u64.high %v330_v35, %v325_v62, %v883_v1  ;;  %v886_v3 = vmul.u32.u64.low %v330_v35, %v329_v0  ;;  %v887_v4 = vmul.u32.u64.high %v330_v35, %v329_v0, %v886_v3 }
 0x180   : > { %v321_v5 = vsel %vm315_vm9, %v318_v60, %v320_v61 }
 0x181   : > { %v340_v6 = vadd.s32 1, %v884_v2  ;;  %v337_v7 = vmul.u32 %v330_v35, %v321_v5  ;;  %vm339_vm11 = vc.u32 %v887_v4, %v883_v1  ;;  %v338_v20 = vadd.s32 %v883_v1, %v887_v4 }
 0x183   : > { %v341_v8 = vsel %vm339_vm11, %v340_v6, %v884_v2 }
 0x184   : > { %v342_v9 = vadd.s32 %v341_v8, %v337_v7 }
 0x186   : > { %v343_v10 = vadd.s32 536870912, %v342_v9 }
 0x188   : > { %v344_v11 = vshrl.u32 %v343_v10, 30 }
 0x18a   : > { %v345_v12 = vshll.u32 %v344_v11, 30  ;;  %v368_v34 = vsub.s32 4, %v344_v11 }
 0x18c   : > { %v346_v13 = vsub.s32 %v342_v9, %v345_v12  ;;  %v369_v37 = vsel %vm284_vm13, %v368_v34, %v344_v11 }
 0x18d   : > { %v371_v38 = vsel %vm283_vm14, 0, %v369_v37 }
 0x18e   : > { %v348_v14 = vsub.s32 0, %v346_v13  ;;  %v375_v39 = vadd.s32 3, %v371_v38  ;;  %v479_v41 = vand.u32 3, %v371_v38 }
 0x190   : > { %v601_v15 = vmin.u32 %v348_v14, %v346_v13  ;;  %v376_v40 = vand.u32 3, %v375_v39  ;;  %vm484_vm0 = vcmp.eq.s32.totalorder %v479_v41, 2  ;;  %vm481_vm2 = vcmp.eq.s32.totalorder %v479_v41, 0 }
 0x191   : > { %vm480_vm4 = vcmp.lt.s32.totalorder %v479_v41, 2 }
 0x192   : > { %v350_v16 = vclz %v601_v15  ;;  %vm381_vm15 = vcmp.eq.s32.totalorder %v376_v40, 2  ;;  %vm378_vm1 = vcmp.eq.s32.totalorder %v376_v40, 0  ;;  %vm377_vm3 = vcmp.lt.s32.totalorder %v376_v40, 2 }
 0x194   : > { %v602_v17 = vadd.s32 4294967294, %v350_v16 }
 0x196   : > { %vm603_vm12 = vcmp.lt.s32.totalorder %v602_v17, 0 }
 0x197   : > { %v353_v18 = vsel %vm603_vm12, 0, %v602_v17 }
 0x198   : > { %v354_v22 = vsub.s32 32, %v353_v18  ;;  %v358_v23 = vsub.s32 4294967266, %v353_v18  ;;  %v355_v24 = vshll.u32 %v346_v13, %v353_v18 }
 0x19a   : > { %v356_v25 = vshrl.u32 %v338_v20, %v354_v22  ;;  %v359_v26 = vadd.s32 127, %v358_v23 }
 0x19c   : > { %v357_v27 = vor.u32 %v356_v25, %v355_v24  ;;  %v360_v28 = vshll.u32 %v359_v26, 23 }
 0x19e   : > { %v361_v29 = vor.u32 4788187, %v360_v28  ;;  %v364_v31 = vcvt.s32.f32 %v357_v27 }
 0x1a0   : > { %v362_v30 = vand.u32 2147483647, %v361_v29 }
 0x1a2   : > { %v365_v32 = vmul.f32 %v364_v31, %v362_v30 }
 0x1a4   : > { %v366_v33 = vxor.u32 2147483648, %v365_v32 }
 0x1a6   : > { %v367_v35 = vsel %vm284_vm13, %v366_v33, %v365_v32 }
 0x1a7   : > { %v370_v36 = vsel %vm283_vm14, %v877_v19, %v367_v35 }
 0x1a8   : > { %690 = vcosq.f32 %v370_v36 }
 0x1a9   : > { %692 = vsinq.f32 %v370_v36 }
 0x1b5   : > { %v691_v42 = vpop.eup %690 }
 0x1b6   : > { %v693_v43 = vpop.eup %692  ;;  %v382_v44 = vxor.u32 2147483648, %v691_v42 }
 0x1b7   : > { %v379_v45 = vxor.u32 2147483648, %v693_v43 }
 0x1b8   : > { %v486_v21 = vsel %vm484_vm0, %v382_v44, %v693_v43  ;;  %v383_v46 = vsel %vm381_vm15, %v382_v44, %v693_v43 }
 0x1b9   : > { %v483_v47 = vsel %vm481_vm2, %v691_v42, %v379_v45  ;;  %v380_v48 = vsel %vm378_vm1, %v691_v42, %v379_v45 }
 0x1ba   : > { %v487_v49 = vsel %vm480_vm4, %v483_v47, %v486_v21  ;;  %v384_v50 = vsel %vm377_vm3, %v380_v48, %v383_v46 }
 0x1bb   : > { %v488_v51 = vsel %vm374_vm5, nan, %v487_v49  ;;  %v385_v52 = vsel %vm374_vm5, nan, %v384_v50 }
 0x1bc   : > { %490 = vrot.lane.b32.xlu1 %v488_v51, %s781_s15 }
 0x22e   : > { %v491_v53 = vpop.permute.xlu1 %490 }
 0x22f   : > { %v494_v55 = vsel %vm493_vm6, %v385_v52, %v491_v53 }
 0x230   : > { %v500_v56 = vmul.f32 %v498_v54, %v494_v55 }
 0x232   : > { %502 = vst.msk [vmem:[%s185_s25] sm:$0xff] %vm501_vm7, %v500_v56 }
 0x233   : > { %707 = shalt.err (!%p704_p5)
}
 0x234   : > { %s708_s11 = scalar_lea.hbm %s516_s6, 128  ;;  %s712_s14 = scalar_lea.hbm %s941_s4, 256 }
 0x235   : > { %p709_p6 = scmp.ne.s32.totalorder %s516_s6, %s708_s11  ;;  %p713_p10 = scmp.lt.s32.totalorder %s516_s6, %s941_s4 }
 0x236   : > { %p714_p11 = scmp.lt.s32.totalorder %s712_s14, %s708_s11 }
 0x237   : > { %p710_p7 = pnand %p709_p6, %p851_p4 }
 0x238   : > { %p715_p12 = por %p714_p11, %p713_p10 }
 0x239   : > { %p711_p9 = pneg %p710_p7 }
 0x23b   : > { %p716_p13 = pnand %p715_p12, %p711_p9 }
 0x23d   : > { %719 = shalt.err (!%p716_p13)
}
 0x23e   : > { %624 = dma.vmem_to_hbm [thread:$0]  (%p851_p4), %s519_s27, 128, %s516_s6, %s504_s7  }
 0x23f PF: > { %p630_p0 = scmp.ge.s32.totalorder %s770_s22, 2  ;;  %s530_s0 = sand.u32 1, %s750_s17  }
 0x240   : > { %s531_s23 = scalar_lea.sflag [#allocation6], %s530_s0 }
 0x241   : > { %p627_p1 = pnand %p630_p0, %p858_p8 }
 0x243   : > { %p628_p2 = pneg %p627_p1 }
 0x245   : > { %745 = dma.done.wait (%p628_p2), %s531_s23, 128  }
 0x246   : > { %747 = vsyncadd (%p628_p2), %s531_s23, 4294967168  ;;  %s18_s22 = sadd.s32 1, %s770_s22   ;;  %s944_s17 = smov %s754_s18 }
 0x247   : > { %p15_p3 = scmp.ge.s32.totalorder %s18_s22, 4   ;;  %s945_s18 = smov %s758_s19 }
 0x248   : > { %s946_s19 = smov %s864_s29  ;;  %s947_s20 = smov %s766_s21 }
 0x249   : > { %s948_s21 = smov %s950_s24  ;;  %17 = sbr.rel (!%p15_p3) target bundleno = 6 (0x6), region = 71 }
 0x24e   :  { %536 = vsyncpa [#allocation6], 1 }
 0x24f   :  { %538 = vsyncpa [#allocation6 + $0x1], 1 }

</bundles_post_ra>
